<compile_context>
chip_gen: v7x
topology: tpu7x:2x2x1
jax: 0.10.0
libtpu: 0.0.40
codegen_flags: <defaults>
</compile_context>

<pallas_src>
import functools

import jax
import jax.numpy as jnp
from jax.experimental import pallas as pl
from jax.experimental.pallas import tpu as pltpu

# ----------------------------------------------------------------------------
# Architecture (verbatim from the PyTorch module)
# ----------------------------------------------------------------------------
architecture_config = [
    (7, 64, 2, 3), (2, 2), (3, 192, 1, 1), (2, 2), (1, 128, 1, 0),
    (3, 256, 1, 1), (1, 256, 1, 0), (3, 512, 1, 1), (2, 2),
    [(1, 256, 1, 0), (3, 512, 1, 1), 4], (1, 512, 1, 0), (3, 1024, 1, 1),
    (2, 2), [(1, 512, 1, 0), (3, 1024, 1, 1), 2], (3, 1024, 1, 1),
    (3, 1024, 2, 1), (3, 1024, 1, 1), (3, 1024, 1, 1),
]

NEG_SLOPE = 0.1
BN_EPS = 1e-5
COMPUTE_DTYPE = jnp.bfloat16   # matmul operand / activation dtype (f32 accum)
# TODO(synk): on v7x the weight-DMA-bound late convs / FC1 could additionally
# be quantized to fp8 (MXU-native there); not done to stay chip-agnostic.


def _round_up(x, m):
    return (x + m - 1) // m * m


def _choose_tile(dim, cap, unit):
    """Largest tile <= cap that is either the full dim or a `unit`-multiple divisor."""
    if dim <= cap:
        return dim                      # full-dim block (exempt from 8/128 rule)
    for t in range(cap, unit - 1, -unit):
        if dim % t == 0:
            return t
    return cap                          # fallback: caller pads


def expand_architecture(in_channels):
    """Expand the config into a flat list of ('conv', k, cin, cout, s, p) / ('pool', k, s)."""
    layers = []
    c = in_channels
    for item in architecture_config:
        if isinstance(item, tuple) and len(item) == 4:
            k, cout, s, p = item
            layers.append(("conv", k, c, cout, s, p))
            c = cout
        elif isinstance(item, tuple) and len(item) == 2:
            layers.append(("pool", item[0], item[1]))
        elif isinstance(item, list):
            (k1, c1, s1, p1), (k2, c2, s2, p2), reps = item
            for _ in range(reps):
                layers.append(("conv", k1, c, c1, s1, p1))
                c = c1
                layers.append(("conv", k2, c, c2, s2, p2))
                c = c2
        else:
            raise ValueError("Unexpected architecture item")
    return layers, c


# ----------------------------------------------------------------------------
# Pallas kernel 1: tiled matmul fused with per-column affine (BN / bias) + LeakyReLU
# ----------------------------------------------------------------------------
def _mm_affine_act_kernel(a_ref, w_ref, scale_ref, shift_ref, o_ref, acc_ref, *, act):
    """Multi-step contraction: f32 accumulator held in VMEM scratch across K steps."""
    k = pl.program_id(2)

    @pl.when(k == 0)
    def _init():
        acc_ref[...] = jnp.zeros_like(acc_ref)

    acc_ref[...] += jnp.dot(a_ref[...], w_ref[...],
                            preferred_element_type=jnp.float32)

    @pl.when(k == pl.num_programs(2) - 1)
    def _finalize():
        y = acc_ref[...] * scale_ref[...] + shift_ref[...]   # f32 epilogue
        if act:
            y = jnp.where(y > 0, y, NEG_SLOPE * y)
        o_ref[...] = y.astype(o_ref.dtype)


def _mm_affine_act_single_kernel(a_ref, w_ref, scale_ref, shift_ref, o_ref, *, act):
    """Single-K-step specialization: no scratch accumulator round-trip, no branches."""
    y = jnp.dot(a_ref[...], w_ref[...], preferred_element_type=jnp.float32)
    y = y * scale_ref[...] + shift_ref[...]
    if act:
        y = jnp.where(y > 0, y, NEG_SLOPE * y)
    o_ref[...] = y.astype(o_ref.dtype)


def matmul_affine_act(a, w, scale, shift, act, out_dtype=COMPUTE_DTYPE):
    """Computes act((a @ w) * scale + shift) with a Pallas TPU kernel.

    a:     (M, K) bf16 (cast if needed)
    w:     (K, N) bf16
    scale: (N,)   f32   (folded BN gamma/sqrt(var+eps), or ones)
    shift: (N,)   f32   (folded BN beta - mean*scale, or bias)
    """
    a = a.astype(COMPUTE_DTYPE)
    w = w.astype(COMPUTE_DTYPE)
    M, K = a.shape
    K2, N = w.shape
    assert K == K2

    tm = _choose_tile(M, 256, 8)       # 256 rows fill the v6e/v7x MXU
    tn = _choose_tile(N, 2048, 128)    # full-width weight blocks -> contiguous DMA
    tk = _choose_tile(K, 2560, 128)

    Mp, Kp, Np = _round_up(M, tm), _round_up(K, tk), _round_up(N, tn)

    # For this network the tiles always divide (or equal) the dims, so these
    # pads are no-ops and no HBM copies are issued; kept as a generic fallback.
    if Mp != M or Kp != K:
        a = jnp.pad(a, ((0, Mp - M), (0, Kp - K)))
    if Kp != K or Np != N:
        w = jnp.pad(w, ((0, Kp - K), (0, Np - N)))
    scale2 = scale.astype(jnp.float32).reshape(1, N)
    shift2 = shift.astype(jnp.float32).reshape(1, N)
    if Np != N:
        scale2 = jnp.pad(scale2, ((0, 0), (0, Np - N)))
        shift2 = jnp.pad(shift2, ((0, 0), (0, Np - N)))

    kgrid = Kp // tk
    grid = (Mp // tm, Np // tn, kgrid)

    in_specs = [
        pl.BlockSpec((tm, tk), lambda i, j, k: (i, k)),
        pl.BlockSpec((tk, tn), lambda i, j, k: (k, j)),
        pl.BlockSpec((1, tn), lambda i, j, k: (0, j)),
        pl.BlockSpec((1, tn), lambda i, j, k: (0, j)),
    ]
    out_spec = pl.BlockSpec((tm, tn), lambda i, j, k: (i, j))

    if kgrid == 1:
        kernel = functools.partial(_mm_affine_act_single_kernel, act=act)
        scratch = []
    else:
        kernel = functools.partial(_mm_affine_act_kernel, act=act)
        scratch = [pltpu.VMEM((tm, tn), jnp.float32)]

    out = pl.pallas_call(
        kernel,
        out_shape=jax.ShapeDtypeStruct((Mp, Np), out_dtype),
        grid_spec=pltpu.PrefetchScalarGridSpec(
            num_scalar_prefetch=0,
            grid=grid,
            in_specs=in_specs,
            out_specs=out_spec,
            scratch_shapes=scratch,
        ),
        compiler_params=pltpu.CompilerParams(
            dimension_semantics=("parallel", "parallel", "arbitrary"),
            vmem_limit_bytes=32 * 1024 * 1024),
    )(a, w, scale2, shift2)

    if Mp != M or Np != N:
        out = out[:M, :N]
    return out


# ----------------------------------------------------------------------------
# Pallas kernel 2: MaxPool2d(kernel=2, stride=2) as 4-way elementwise max
# ----------------------------------------------------------------------------
def _max4_kernel(a_ref, b_ref, c_ref, d_ref, o_ref):
    o_ref[...] = jnp.maximum(jnp.maximum(a_ref[...], b_ref[...]),
                             jnp.maximum(c_ref[...], d_ref[...]))


def maxpool2x2(x):
    """x: (B, H, W, C) NHWC, H and W even.  Lane-dense 2-D views (last dim Wo*C)."""
    B, H, W, C = x.shape
    Ho, Wo = H // 2, W // 2
    # TODO(synk): the 4 phase slices are materialized by XLA before the call;
    # fusing the strided reads into the kernel would save ~2x HBM traffic on the
    # (tiny) pooling layers but is noise vs. the weight-DMA-bound conv layers.
    phases = (x[:, 0::2, 0::2, :], x[:, 1::2, 0::2, :],
              x[:, 0::2, 1::2, :], x[:, 1::2, 1::2, :])
    phases = tuple(p.reshape(B * Ho, Wo * C) for p in phases)
    full = pl.BlockSpec((B * Ho, Wo * C), lambda i: (0, 0))
    out = pl.pallas_call(
        _max4_kernel,
        out_shape=jax.ShapeDtypeStruct((B * Ho, Wo * C), x.dtype),
        grid_spec=pltpu.PrefetchScalarGridSpec(
            num_scalar_prefetch=0,
            grid=(1,),
            in_specs=[full, full, full, full],
            out_specs=full,
        ),
    )(*phases)
    return out.reshape(B, Ho, Wo, C)


# ----------------------------------------------------------------------------
# im2col glue (plain JAX) -- only used for k > 1 convolutions
# ----------------------------------------------------------------------------
# TODO(synk): fusing the shifted-window reads of the NHWC activation directly
# into the matmul kernel (pl.Element offsets over a (kh, kw) grid axis) would
# remove this remaining HBM round trip for the 3x3 / 7x7 convs.
def extract_patches(x, k, s, p):
    """x: (B, H, W, C) -> (B*Ho*Wo, k*k*C) patches ordered (kh, kw, cin)."""
    if p > 0:
        x = jnp.pad(x, ((0, 0), (p, p), (p, p), (0, 0)))
    B, H, W, C = x.shape
    Ho = (H - k) // s + 1
    Wo = (W - k) // s + 1
    cols = []
    for i in range(k):
        for j in range(k):
            cols.append(x[:, i:i + s * (Ho - 1) + 1:s, j:j + s * (Wo - 1) + 1:s, :])
    patches = jnp.stack(cols, axis=3)              # (B, Ho, Wo, k*k, C)
    return patches.reshape(B * Ho * Wo, k * k * C), Ho, Wo


# ----------------------------------------------------------------------------
# Deterministic parameter construction (synthetic; no checkpoint load)
# ----------------------------------------------------------------------------
def init_params(key, layers, grid_size=1, num_classes=20, num_bbox=2):
    params = {"convs": [], "fc": None}
    for layer in layers:
        if layer[0] != "conv":
            continue
        _, k, cin, cout, s, p = layer
        key, kw, kg, kb, km, kv = jax.random.split(key, 6)
        w = jax.random.normal(kw, (cout, cin, k, k), jnp.float32)
        w = w * jnp.sqrt(2.0 / (cin * k * k))
        # weight laid out for im2col matmul: (k*k*cin, cout), contraction order (kh, kw, cin)
        w2d = jnp.transpose(w, (2, 3, 1, 0)).reshape(k * k * cin, cout)
        gamma = 1.0 + 0.1 * jax.random.normal(kg, (cout,), jnp.float32)
        beta = 0.1 * jax.random.normal(kb, (cout,), jnp.float32)
        run_mean = 0.01 * jax.random.normal(km, (cout,), jnp.float32)
        run_var = jax.random.uniform(kv, (cout,), jnp.float32, 0.5, 1.5)
        # eval-mode BatchNorm folded into per-channel affine (kept in f32)
        scale = gamma / jnp.sqrt(run_var + BN_EPS)
        shift = beta - run_mean * scale
        params["convs"].append((w2d.astype(COMPUTE_DTYPE), scale, shift))

    fc_in = 1024 * grid_size * grid_size
    fc_out = grid_size * grid_size * (num_classes + num_bbox * 5)
    key, k1, k2, k3, k4 = jax.random.split(key, 5)
    W1 = jax.random.normal(k1, (fc_in, 4096), jnp.float32) / jnp.sqrt(fc_in)
    b1 = 0.01 * jax.random.normal(k2, (4096,), jnp.float32)
    W2 = jax.random.normal(k3, (4096, fc_out), jnp.float32) / jnp.sqrt(4096.0)
    b2 = 0.01 * jax.random.normal(k4, (fc_out,), jnp.float32)
    params["fc"] = (W1.astype(COMPUTE_DTYPE), b1, W2.astype(COMPUTE_DTYPE), b2)
    return params


# ----------------------------------------------------------------------------
# Forward pass
# ----------------------------------------------------------------------------
def yolo_v1_forward(x_nchw, params, layers):
    x = jnp.transpose(x_nchw, (0, 2, 3, 1)).astype(COMPUTE_DTYPE)  # NCHW -> NHWC
    conv_idx = 0
    for layer in layers:
        if layer[0] == "conv":
            _, k, cin, cout, s, p = layer
            B, H, W, _ = x.shape
            if k == 1 and s == 1 and p == 0:
                # 1x1 conv: no im2col, just a reshape
                patches, Ho, Wo = x.reshape(B * H * W, cin), H, W
            else:
                patches, Ho, Wo = extract_patches(x, k, s, p)
            w2d, scale, shift = params["convs"][conv_idx]
            y = matmul_affine_act(patches, w2d, scale, shift, act=True,
                                  out_dtype=COMPUTE_DTYPE)
            x = y.reshape(B, Ho, Wo, cout)
            conv_idx += 1
        else:  # maxpool 2x2 / stride 2
            x = maxpool2x2(x)

    # nn.Flatten on NCHW ordering
    B = x.shape[0]
    flat = jnp.transpose(x, (0, 3, 1, 2)).reshape(B, -1)

    W1, b1, W2, b2 = params["fc"]
    # Linear -> Dropout -> LeakyReLU -> Linear
    # TODO(synk): nn.Dropout(p=0.5) is identity in eval mode; training-mode RNG mask not implemented.
    ones1 = jnp.ones((W1.shape[1],), jnp.float32)
    ones2 = jnp.ones((W2.shape[1],), jnp.float32)
    h = matmul_affine_act(flat, W1, ones1, b1, act=True, out_dtype=COMPUTE_DTYPE)
    out = matmul_affine_act(h, W2, ones2, b2, act=False, out_dtype=jnp.float32)
    return out


# ----------------------------------------------------------------------------
# Main
# ----------------------------------------------------------------------------
if __name__ == "__main__":
    GRID_SIZE = 1           # small config: input 64x64 -> backbone output 1x1x1024
    NUM_CLASSES = 20
    NUM_BBOX = 2
    IN_CHANNELS = 3
    BATCH = 2
    SPATIAL = 64 * GRID_SIZE

    layers, final_c = expand_architecture(IN_CHANNELS)
    assert final_c == 1024

    key = jax.random.PRNGKey(0)
    key, kx = jax.random.split(key)
    x = jax.random.normal(kx, (BATCH, IN_CHANNELS, SPATIAL, SPATIAL), jnp.float32)

    params = init_params(key, layers, GRID_SIZE, NUM_CLASSES, NUM_BBOX)

    out = yolo_v1_forward(x, params, layers)
    out = jax.block_until_ready(out)

    expected = (BATCH, GRID_SIZE * GRID_SIZE * (NUM_CLASSES + NUM_BBOX * 5))
    assert out.shape == expected, (out.shape, expected)
    assert out.dtype == jnp.float32
    assert bool(jnp.all(jnp.isfinite(out)))
    print("KERNEL_OK")
</pallas_src>

<mosaic_0001>
module attributes {stable_mosaic.version = 11 : i64} {
  func.func @_mm_affine_act_single_kernel(%arg0: i32, %arg1: i32, %arg2: i32, %arg3: memref<256x147xbf16, #tpu.memory_space<vmem>>, %arg4: memref<147x64xbf16, #tpu.memory_space<vmem>>, %arg5: memref<1x64xf32, #tpu.memory_space<vmem>>, %arg6: memref<1x64xf32, #tpu.memory_space<vmem>>, %arg7: memref<256x64xbf16, #tpu.memory_space<vmem>>) attributes {dimension_semantics = [#tpu.dimension_semantics<parallel>, #tpu.dimension_semantics<parallel>, #tpu.dimension_semantics<arbitrary>], iteration_bounds = array<i64: 8, 1, 1>, scalar_prefetch = 0 : i64, scratch_operands = 0 : i64, tpu.core_type = #tpu.core_type<tc>, window_params = [{transform_indices = @transform_0, window_bounds = array<i64: 256, 147>}, {transform_indices = @transform_1, window_bounds = array<i64: 147, 64>}, {transform_indices = @transform_2, window_bounds = array<i64: 1, 64>}, {transform_indices = @transform_3, window_bounds = array<i64: 1, 64>}, {transform_indices = @transform_4, window_bounds = array<i64: 256, 64>}]} {
    %c0 = arith.constant 0 : index
    %c0_0 = arith.constant 0 : index
    %0 = vector.load %arg3[%c0, %c0_0] : memref<256x147xbf16, #tpu.memory_space<vmem>>, vector<256x147xbf16>
    %c0_1 = arith.constant 0 : index
    %c0_2 = arith.constant 0 : index
    %1 = vector.load %arg4[%c0_1, %c0_2] : memref<147x64xbf16, #tpu.memory_space<vmem>>, vector<147x64xbf16>
    %cst = arith.constant dense<0.000000e+00> : vector<256x64xf32>
    %2 = tpu.matmul %0, %1, %cst {dimension_numbers = #tpu.dot_dimension_numbers<[1], [0], [0], [1], [0, 0, 1, 1], [], []>} : vector<256x147xbf16>, vector<147x64xbf16>, vector<256x64xf32> -> vector<256x64xf32>
    %c0_3 = arith.constant 0 : index
    %c0_4 = arith.constant 0 : index
    %3 = vector.load %arg5[%c0_3, %c0_4] : memref<1x64xf32, #tpu.memory_space<vmem>>, vector<1x64xf32>
    %4 = vector.broadcast %3 : vector<1x64xf32> to vector<256x64xf32>
    %5 = arith.mulf %2, %4 : vector<256x64xf32>
    %c0_5 = arith.constant 0 : index
    %c0_6 = arith.constant 0 : index
    %6 = vector.load %arg6[%c0_5, %c0_6] : memref<1x64xf32, #tpu.memory_space<vmem>>, vector<1x64xf32>
    %7 = vector.broadcast %6 : vector<1x64xf32> to vector<256x64xf32>
    %8 = arith.addf %5, %7 : vector<256x64xf32>
    %cst_7 = arith.constant 0.000000e+00 : f32
    %9 = vector.broadcast %cst_7 : f32 to vector<256x64xf32>
    %10 = arith.cmpf ogt, %8, %9 : vector<256x64xf32>
    %cst_8 = arith.constant 1.000000e-01 : f32
    %11 = vector.broadcast %cst_8 : f32 to vector<256x64xf32>
    %12 = arith.mulf %11, %8 : vector<256x64xf32>
    %13 = arith.select %10, %8, %12 : vector<256x64xi1>, vector<256x64xf32>
    %14 = arith.truncf %13 : vector<256x64xf32> to vector<256x64xbf16>
    %c0_9 = arith.constant 0 : index
    %c0_10 = arith.constant 0 : index
    %15 = vector.load %arg7[%c0_9, %c0_10] : memref<256x64xbf16, #tpu.memory_space<vmem>>, vector<256x64xbf16>
    tpu.vector_store %arg7[%c0_9, %c0_10], %14 {strides = array<i32>} : memref<256x64xbf16, #tpu.memory_space<vmem>>, vector<256x64xbf16>,
    return
  }
  func.func @transform_0(%arg0: i32, %arg1: i32, %arg2: i32) -> (i32, i32) {
    %c0_i32 = arith.constant 0 : i32
    return %arg0, %arg2 : i32, i32
  }
  func.func @transform_1(%arg0: i32, %arg1: i32, %arg2: i32) -> (i32, i32) {
    %c0_i32 = arith.constant 0 : i32
    return %arg2, %arg1 : i32, i32
  }
  func.func @transform_2(%arg0: i32, %arg1: i32, %arg2: i32) -> (i32, i32) {
    %c0_i32 = arith.constant 0 : i32
    %c0_i32_0 = arith.constant 0 : i32
    return %c0_i32, %arg1 : i32, i32
  }
  func.func @transform_3(%arg0: i32, %arg1: i32, %arg2: i32) -> (i32, i32) {
    %c0_i32 = arith.constant 0 : i32
    %c0_i32_0 = arith.constant 0 : i32
    return %c0_i32, %arg1 : i32, i32
  }
  func.func @transform_4(%arg0: i32, %arg1: i32, %arg2: i32) -> (i32, i32) {
    %c0_i32 = arith.constant 0 : i32
    return %arg0, %arg1 : i32, i32
  }
}

</mosaic_0001>

<bundles_post_ra>
// kernel: tpu_custom_call.1
= control target key start
LH: loop header
LB: loop body
LE: loop exit
PB: predicated region body
PF: predicated region fallthrough
CT: control target
= control target key end

     0   :  { %s1534_s15 = smov 0   ;;  %s1536_s16 = smov 0   ;;  %s1791_s0 = inlined_call_operand.vmem [shape: bf16[2048,147], index: 0, kind: input, shape index: {}]   ;;  %s1792_s1 = inlined_call_operand.vmem [shape: bf16[147,64], index: 1, kind: input, shape index: {}]   ;;  %s1793_s2 = inlined_call_operand.vmem [shape: f32[1,64], index: 2, kind: input, shape index: {}]   ;;  %s1794_s3 = inlined_call_operand.vmem [shape: f32[1,64], index: 3, kind: input, shape index: {}]   ;;  %s1795_s4 = inlined_call_operand.vmem [shape: bf16[2048,64], index: 4, kind: output, shape index: {}]  }
   0x1   :  { %s1538_s17 = smov 0  }
   0x2 LB: > { %s33_s18 = sadd.s32 1, %s1501_s16  ;;  %p1246_p0 = scmp.ge.s32.totalorder %s1505_s17, 1  ;;  %s1505_s17 = sphi %s1538_s17, %s14_s17   ;;  %s1501_s16 = sphi %s1536_s16, %s1797_s16   ;;  %s1497_s15 = sphi %s1534_s15, %s1796_s15  }
   0x3   : > { %p35_p1 = scmp.ge.s32.totalorder %s33_s18, 8  ;;  %p224_p2 = scmp.lt.s32.totalorder %s1505_s17, 9 }
   0x5   : > { %s1799_s18 = smov (%p35_p1, %s33_s18), 0  ;;  %p225_p3 = pnand %p1246_p0, %p224_p2 }
   0x6   : > { %v1425_v0 = vld [vmem:[%s1792_s1] sm:$0xff] (!%p225_p3)   ;;  %v1507_v1 = vmov (!%p225_p3), 0   ;;  %v1426_v2 = vld [vmem:[%s1792_s1 + $0x8] sm:$0xff] (!%p225_p3)   ;;  %v1427_v3 = vld [vmem:[%s1792_s1 + $0x10] sm:$0xff] (!%p225_p3)   ;;  %s1247_s25 = sshll.u32 (!%p225_p3), %s1497_s15, 5  ;;  %vm561_vm0 = vcmask (!%p225_p3), 154624  }
   0x7   : > { %228 = sbr.rel (%p225_p3) target bundleno = 329 (0x149), region = 36  ;;  %617 = vmatprep.subr.bf16.mxu0 (!%p225_p3), %v1507_v1  ;;  %1379 = vmatprep.subr.bf16.mxu1 (!%p225_p3), %v1507_v1  ;;  %p274_p4 = scmp.lt.s32.totalorder (!%p225_p3), %s1247_s25, 255  ;;  %v1428_v4 = vld [vmem:[%s1792_s1 + $0x18] sm:$0xff] (!%p225_p3)   ;;  %v1429_v5 = vld [vmem:[%s1792_s1 + $0x20] sm:$0xff] (!%p225_p3)   ;;  %v1430_v8 = vld [vmem:[%s1792_s1 + $0x28] sm:$0xff] (!%p225_p3)   ;;  %vm610_vm1 = vcmask (!%p225_p3), 1040384  }
   0x8   : > { %618 = vmatpush1.bf16.msra.mxu0 (!%p225_p3), %v1425_v0  ;;  %1389 = vmatpush1.bf16.msra.mxu1 (!%p225_p3), %v1425_v0  ;;  %v1431_v9 = vld [vmem:[%s1792_s1 + $0x30] sm:$0xff] (!%p225_p3)   ;;  %v1432_v10 = vld [vmem:[%s1792_s1 + $0x38] sm:$0xff] (!%p225_p3)   ;;  %vm611_vm2 = vcmask (!%p225_p3), 1041408   ;;  %v1508_v11 = vmov (!%p225_p3), 65535   ;;  %v1433_v13 = vld [vmem:[%s1792_s1 + $0x40] sm:$0xff] (!%p225_p3)   ;;  %vm1080_vm5 = vcmask (!%p225_p3), 519168  }
   0x9   : > { %619 = vmatprep.subr.bf16.mxu0 (!%p225_p3), %v1507_v1  ;;  %1380 = vmatprep.subr.bf16.mxu1 (!%p225_p3), %v1507_v1  ;;  %v612_v12 = vsel (!%p225_p3), %vm610_vm1, 4294967295, %v1508_v11  ;;  %v1434_v14 = vld [vmem:[%s1792_s1 + $0x48] ss:$0 sps:$4 sm:$0x33] (!%p225_p3)   ;;  %v1641_v47 = vld [vmem:[%s1793_s2] ss:$0 sm:$0xff] (!%p225_p3) }
   0xa   : > { %v613_v15 = vsel (!%p225_p3), %vm611_vm2, %v612_v12, 0  ;;  %v1646_v49 = vld [vmem:[%s1794_s3] ss:$0 sm:$0xff] (!%p225_p3) }
   0xb   : > { %v615_v16 = vand.u32 (!%p225_p3), %v1434_v14, %v613_v15 }
   0xc   : > { %620 = vmatpush1.bf16.msra.mxu0 (!%p225_p3), %v1426_v2  ;;  %1390 = vmatpush1.bf16.msra.mxu1 (!%p225_p3), %v1426_v2 }
   0xd   : > { %621 = vmatprep.subr.bf16.mxu0 (!%p225_p3), %v1507_v1  ;;  %1381 = vmatprep.subr.bf16.mxu1 (!%p225_p3), %v1507_v1 }
   0xe   : > { %s1801_s25 = smov (!%p274_p4, %s1247_s25), 255 }
   0xf   : > { %s1346_s28 = sshll.u32 %s1801_s25, 3  ;;  %s1251_s26 = sshll.u32 %s1801_s25, 2 }
  0x10   : > { %622 = vmatpush1.bf16.msra.mxu0 %v1427_v3  ;;  %1391 = vmatpush1.bf16.msra.mxu1 %v1427_v3  ;;  %s1570_s5 = scalar_lea.vmem %s1791_s0, %s1346_s28  ;;  %s1660_s29 = scalar_lea.vmem %s1795_s4, %s1251_s26 }
  0x11   : > { %623 = vmatprep.subr.bf16.mxu0 %v1507_v1  ;;  %1382 = vmatprep.subr.bf16.mxu1 %v1507_v1  ;;  %v1437_v6 = vld [vmem:[%s1570_s5 + $0x4] ss:$8 sps:$4 sm:$0xff]   ;;  %v1435_v17 = vld [vmem:[%s1570_s5] ss:$8 sps:$4 sm:$0xff]   ;;  %v1441_v19 = vld [vmem:[%s1570_s5 + $0x14] ss:$8 sps:$4 sm:$0xff]  }
  0x12   : > { %v1440_v7 = vld [vmem:[%s1570_s5 + $0x84] ss:$8 sps:$4 sm:$0xff]   ;;  %1294 = vmatprep.mubr.msk.bf16.mxu0 %vm561_vm0, %v1437_v6  ;;  %v1438_v18 = vld [vmem:[%s1570_s5 + $0x80] ss:$8 sps:$4 sm:$0xff]   ;;  %v1443_v20 = vld [vmem:[%s1570_s5 + $0x94] ss:$8 sps:$4 sm:$0xff]  }
  0x13   : > { %1302 = vmatprep.mubr.msk.bf16.mxu1 %vm561_vm0, %v1440_v7  ;;  %v1445_v21 = vld [vmem:[%s1570_s5 + $0x10] ss:$8 sps:$4 sm:$0xff]   ;;  %v1447_v23 = vld [vmem:[%s1570_s5 + $0x24] ss:$8 sps:$4 sm:$0xff]   ;;  %v1451_v25 = vld [vmem:[%s1570_s5 + $0x20] ss:$8 sps:$4 sm:$0xff]  }
  0x14   : > { %624 = vmatpush1.bf16.msra.mxu0 %v1428_v4  ;;  %1392 = vmatpush1.bf16.msra.mxu1 %v1428_v4  ;;  %v1446_v22 = vld [vmem:[%s1570_s5 + $0x90] ss:$8 sps:$4 sm:$0xff]   ;;  %v1449_v24 = vld [vmem:[%s1570_s5 + $0xa4] ss:$8 sps:$4 sm:$0xff]   ;;  %v1452_v26 = vld [vmem:[%s1570_s5 + $0xa0] ss:$8 sps:$4 sm:$0xff]  }
  0x15   : > { %625 = vmatprep.subr.bf16.mxu0 %v1507_v1  ;;  %1383 = vmatprep.subr.bf16.mxu1 %v1507_v1  ;;  %v1453_v27 = vld [vmem:[%s1570_s5 + $0x34] ss:$8 sps:$4 sm:$0xff]   ;;  %v1457_v29 = vld [vmem:[%s1570_s5 + $0x30] ss:$8 sps:$4 sm:$0xff]   ;;  %v1459_v31 = vld [vmem:[%s1570_s5 + $0x44] ss:$8 sps:$4 sm:$0xff]  }
  0x16   : > { %v1455_v28 = vld [vmem:[%s1570_s5 + $0xb4] ss:$8 sps:$4 sm:$0xff]   ;;  %v1458_v30 = vld [vmem:[%s1570_s5 + $0xb0] ss:$8 sps:$4 sm:$0xff]   ;;  %v1461_v32 = vld [vmem:[%s1570_s5 + $0xc4] ss:$8 sps:$4 sm:$0xff]  }
  0x17   : > { %v1463_v33 = vld [vmem:[%s1570_s5 + $0x40] ss:$8 sps:$4 sm:$0xff]   ;;  %v1465_v35 = vld [vmem:[%s1570_s5 + $0x54] ss:$8 sps:$4 sm:$0xff]   ;;  %v1469_v37 = vld [vmem:[%s1570_s5 + $0x50] ss:$8 sps:$4 sm:$0xff]  }
  0x18   : > { %626 = vmatpush1.bf16.msra.mxu0 %v1429_v5  ;;  %1393 = vmatpush1.bf16.msra.mxu1 %v1429_v5  ;;  %v1464_v34 = vld [vmem:[%s1570_s5 + $0xc0] ss:$8 sps:$4 sm:$0xff]   ;;  %v1467_v36 = vld [vmem:[%s1570_s5 + $0xd4] ss:$8 sps:$4 sm:$0xff]   ;;  %v1470_v38 = vld [vmem:[%s1570_s5 + $0xd0] ss:$8 sps:$4 sm:$0xff]  }
  0x19   : > { %627 = vmatprep.subr.bf16.mxu0 %v1507_v1  ;;  %1384 = vmatprep.subr.bf16.mxu1 %v1507_v1  ;;  %v1471_v39 = vld [vmem:[%s1570_s5 + $0x64] ss:$8 sps:$4 sm:$0xff]   ;;  %v1475_v41 = vld [vmem:[%s1570_s5 + $0x60] ss:$8 sps:$4 sm:$0xff]   ;;  %v1477_v43 = vld [vmem:[%s1570_s5 + $0x74] ss:$8 sps:$4 sm:$0xff]  }
  0x1a   : > { %v1473_v40 = vld [vmem:[%s1570_s5 + $0xe4] ss:$8 sps:$4 sm:$0xff]   ;;  %v1476_v42 = vld [vmem:[%s1570_s5 + $0xe0] ss:$8 sps:$4 sm:$0xff]   ;;  %v1479_v44 = vld [vmem:[%s1570_s5 + $0xf4] ss:$8 sps:$4 sm:$0xff]  }
  0x1b   : > { %v1481_v45 = vld [vmem:[%s1570_s5 + $0x70] ss:$8 sps:$4 sm:$0xff]  }
  0x1c   : > { %628 = vmatpush1.bf16.msra.mxu0 %v1430_v8  ;;  %1394 = vmatpush1.bf16.msra.mxu1 %v1430_v8  ;;  %v1482_v46 = vld [vmem:[%s1570_s5 + $0xf0] ss:$8 sps:$4 sm:$0xff]  }
  0x1d   : > { %629 = vmatprep.subr.bf16.mxu0 %v1507_v1  ;;  %1385 = vmatprep.subr.bf16.mxu1 %v1507_v1 }
  0x20   : > { %630 = vmatpush1.bf16.msra.mxu0 %v1431_v9  ;;  %1395 = vmatpush1.bf16.msra.mxu1 %v1431_v9 }
  0x21   : > { %631 = vmatprep.subr.bf16.mxu0 %v1507_v1  ;;  %1386 = vmatprep.subr.bf16.mxu1 %v1507_v1 }
  0x24   : > { %632 = vmatpush1.bf16.msra.mxu0 %v1432_v10  ;;  %1396 = vmatpush1.bf16.msra.mxu1 %v1432_v10 }
  0x25   : > { %633 = vmatprep.subr.bf16.mxu0 %v1507_v1  ;;  %1387 = vmatprep.subr.bf16.mxu1 %v1507_v1 }
  0x28   : > { %634 = vmatpush1.bf16.msra.mxu0 %v1433_v13  ;;  %1397 = vmatpush1.bf16.msra.mxu1 %v1433_v13 }
  0x29   : > { %635 = vmatprep.subr.bf16.mxu0 %v1507_v1  ;;  %1388 = vmatprep.subr.bf16.mxu1 %v1507_v1 }
  0x2c   : > { %636 = vmatpush1.bf16.msra.mxu0 %v615_v16  ;;  %1398 = vmatpush1.bf16.msra.mxu1 %v615_v16 }
  0x2f   : > { %650 = vmatmul.mubr.bf16.vlgmr.msra.gmra.mrb[0].mxu0 %v1435_v17  ;;  %714 = vmatmul.mubr.bf16.vlgmr.msra.gmra.mrb[0].mxu1 %v1438_v18 }
  0x30   : > { %1295 = vmatprep.mubr.msk.bf16.mxu0 %vm561_vm0, %v1441_v19  ;;  %1303 = vmatprep.mubr.msk.bf16.mxu1 %vm561_vm0, %v1443_v20 }
  0x37   : > { %658 = vmatmul.mubr.bf16.gmra.mrb[4].mxu0 %v1445_v21  ;;  %722 = vmatmul.mubr.bf16.gmra.mrb[4].mxu1 %v1446_v22 }
  0x38   : > { %1296 = vmatprep.mubr.msk.bf16.mxu0 %vm561_vm0, %v1447_v23  ;;  %1304 = vmatprep.mubr.msk.bf16.mxu1 %vm561_vm0, %v1449_v24 }
  0x3f   : > { %666 = vmatmul.mubr.bf16.gmra.mrb[8].mxu0 %v1451_v25  ;;  %730 = vmatmul.mubr.bf16.gmra.mrb[8].mxu1 %v1452_v26 }
  0x40   : > { %1297 = vmatprep.mubr.msk.bf16.mxu0 %vm561_vm0, %v1453_v27  ;;  %1305 = vmatprep.mubr.msk.bf16.mxu1 %vm561_vm0, %v1455_v28 }
  0x47   : > { %674 = vmatmul.mubr.bf16.gmra.mrb[12].mxu0 %v1457_v29  ;;  %738 = vmatmul.mubr.bf16.gmra.mrb[12].mxu1 %v1458_v30 }
  0x48   : > { %1298 = vmatprep.mubr.msk.bf16.mxu0 %vm561_vm0, %v1459_v31  ;;  %1306 = vmatprep.mubr.msk.bf16.mxu1 %vm561_vm0, %v1461_v32 }
  0x4f   : > { %682 = vmatmul.mubr.bf16.gmra.mrb[16].mxu0 %v1463_v33  ;;  %746 = vmatmul.mubr.bf16.gmra.mrb[16].mxu1 %v1464_v34 }
  0x50   : > { %1299 = vmatprep.mubr.msk.bf16.mxu0 %vm561_vm0, %v1465_v35  ;;  %1307 = vmatprep.mubr.msk.bf16.mxu1 %vm561_vm0, %v1467_v36 }
  0x57   : > { %690 = vmatmul.mubr.bf16.gmra.mrb[20].mxu0 %v1469_v37  ;;  %754 = vmatmul.mubr.bf16.gmra.mrb[20].mxu1 %v1470_v38 }
  0x58   : > { %1300 = vmatprep.mubr.msk.bf16.mxu0 %vm561_vm0, %v1471_v39  ;;  %1308 = vmatprep.mubr.msk.bf16.mxu1 %vm561_vm0, %v1473_v40 }
  0x5f   : > { %698 = vmatmul.mubr.bf16.gmra.mrb[24].mxu0 %v1475_v41  ;;  %762 = vmatmul.mubr.bf16.gmra.mrb[24].mxu1 %v1476_v42 }
  0x60   : > { %1301 = vmatprep.mubr.msk.bf16.mxu0 %vm561_vm0, %v1477_v43  ;;  %1309 = vmatprep.mubr.msk.bf16.mxu1 %vm561_vm0, %v1479_v44 }
  0x67   : > { %706 = vmatmul.mubr.bf16.gmra.mrb[28].mxu0 %v1481_v45  ;;  %770 = vmatmul.mubr.bf16.gmra.mrb[28].mxu1 %v1482_v46 }
 0x102   : > { %v651_v48 = vpop.f32.mrb[0].mxu0  ;;  %v715_v50 = vpop.f32.mrb[0].mxu1 }
 0x103   : > { %v785_v51 = vmul.f32 %v1641_v47, %v651_v48  ;;  %v801_v52 = vmul.f32 %v1641_v47, %v715_v50  ;;  %v653_v53 = vpop.f32.mrb[1].mxu0  ;;  %v717_v54 = vpop.f32.mrb[1].mxu1 }
 0x104   : > { %v654_v55 = vpop.f32.mrb[2].mxu0  ;;  %v718_v56 = vpop.f32.mrb[2].mxu1 }
 0x105   : > { %v824_v57 = vadd.f32 %v1646_v49, %v785_v51  ;;  %v840_v58 = vadd.f32 %v1646_v49, %v801_v52  ;;  %v786_v59 = vmul.f32 %v1641_v47, %v654_v55  ;;  %v802_v60 = vmul.f32 %v1641_v47, %v718_v56  ;;  %v656_v61 = vpop.f32.mrb[3].mxu0  ;;  %v720_v62 = vpop.f32.mrb[3].mxu1 }
 0x107   : > { %vm856_vm3 = vcmp.gt.f32.partialorder %v824_v57, 0.0  ;;  %v888_v63 = vmul.f32 0.1, %v824_v57  ;;  %vm872_vm4 = vcmp.gt.f32.partialorder %v840_v58, 0.0  ;;  %v904_v0 = vmul.f32 0.1, %v840_v58 }
 0x108   : > { %v825_v1 = vadd.f32 %v1646_v49, %v786_v59  ;;  %v841_v2 = vadd.f32 %v1646_v49, %v802_v60 }
 0x109   : > { %v920_v3 = vsel %vm856_vm3, %v824_v57, %v888_v63  ;;  %v936_v4 = vsel %vm872_vm4, %v840_v58, %v904_v0 }
 0x10a   : > { %v1347_v5 = vpack.c.bf16 %v920_v3, %v920_v3  ;;  %v1363_v6 = vpack.c.bf16 %v936_v4, %v936_v4  ;;  %vm857_vm6 = vcmp.gt.f32.partialorder %v825_v1, 0.0  ;;  %v889_v7 = vmul.f32 0.1, %v825_v1  ;;  %v659_v8 = vpop.f32.mrb[4].mxu0  ;;  %v723_v9 = vpop.f32.mrb[4].mxu1 }
 0x10b   : > { %vm873_vm7 = vcmp.gt.f32.partialorder %v841_v2, 0.0  ;;  %v905_v10 = vmul.f32 0.1, %v841_v2  ;;  %v787_v11 = vmul.f32 %v1641_v47, %v659_v8  ;;  %v803_v12 = vmul.f32 %v1641_v47, %v723_v9  ;;  %v661_v13 = vpop.f32.mrb[5].mxu0  ;;  %v725_v14 = vpop.f32.mrb[5].mxu1 }
 0x10c   : > { %1081 = vst.msk [vmem:[%s1660_s29] sm:$0xf] %vm1080_vm5, %v1347_v5  ;;  %1097 = vst.msk [vmem:[%s1660_s29 + $0x40] sm:$0xf] %vm1080_vm5, %v1363_v6  ;;  %v921_v15 = vsel %vm857_vm6, %v825_v1, %v889_v7  ;;  %v662_v16 = vpop.f32.mrb[6].mxu0  ;;  %v726_v17 = vpop.f32.mrb[6].mxu1 }
 0x10d   : > { %v1348_v18 = vpack.c.bf16 %v921_v15, %v921_v15  ;;  %v937_v19 = vsel %vm873_vm7, %v841_v2, %v905_v10  ;;  %v826_v20 = vadd.f32 %v1646_v49, %v787_v11  ;;  %v842_v21 = vadd.f32 %v1646_v49, %v803_v12  ;;  %v664_v22 = vpop.f32.mrb[7].mxu0  ;;  %v728_v23 = vpop.f32.mrb[7].mxu1 }
 0x10e   : > { %v1364_v24 = vpack.c.bf16 %v937_v19, %v937_v19  ;;  %v788_v25 = vmul.f32 %v1641_v47, %v662_v16  ;;  %v804_v26 = vmul.f32 %v1641_v47, %v726_v17 }
 0x10f   : > { %1082 = vst.msk [vmem:[%s1660_s29 + $0x4] sm:$0xf] %vm1080_vm5, %v1348_v18  ;;  %vm858_vm8 = vcmp.gt.f32.partialorder %v826_v20, 0.0  ;;  %v890_v27 = vmul.f32 0.1, %v826_v20  ;;  %vm874_vm9 = vcmp.gt.f32.partialorder %v842_v21, 0.0 }
 0x110   : > { %v906_v28 = vmul.f32 0.1, %v842_v21  ;;  %1098 = vst.msk [vmem:[%s1660_s29 + $0x44] sm:$0xf] %vm1080_vm5, %v1364_v24  ;;  %v827_v29 = vadd.f32 %v1646_v49, %v788_v25  ;;  %v843_v30 = vadd.f32 %v1646_v49, %v804_v26 }
 0x111   : > { %v922_v31 = vsel %vm858_vm8, %v826_v20, %v890_v27 }
 0x112   : > { %v938_v32 = vsel %vm874_vm9, %v842_v21, %v906_v28  ;;  %v1349_v33 = vpack.c.bf16 %v922_v31, %v922_v31  ;;  %vm859_vm10 = vcmp.gt.f32.partialorder %v827_v29, 0.0  ;;  %v891_v35 = vmul.f32 0.1, %v827_v29  ;;  %v667_v36 = vpop.f32.mrb[8].mxu0  ;;  %v731_v37 = vpop.f32.mrb[8].mxu1 }
 0x113   : > { %v1365_v34 = vpack.c.bf16 %v938_v32, %v938_v32  ;;  %vm875_vm11 = vcmp.gt.f32.partialorder %v843_v30, 0.0  ;;  %v907_v38 = vmul.f32 0.1, %v843_v30  ;;  %v789_v39 = vmul.f32 %v1641_v47, %v667_v36  ;;  %v669_v41 = vpop.f32.mrb[9].mxu0  ;;  %v733_v42 = vpop.f32.mrb[9].mxu1 }
 0x114   : > { %v805_v40 = vmul.f32 %v1641_v47, %v731_v37  ;;  %1083 = vst.msk [vmem:[%s1660_s29 + $0x8] sm:$0xf] %vm1080_vm5, %v1349_v33  ;;  %v923_v43 = vsel %vm859_vm10, %v827_v29, %v891_v35  ;;  %v670_v44 = vpop.f32.mrb[10].mxu0  ;;  %v734_v45 = vpop.f32.mrb[10].mxu1 }
 0x115   : > { %1099 = vst.msk [vmem:[%s1660_s29 + $0x48] sm:$0xf] %vm1080_vm5, %v1365_v34  ;;  %v1350_v46 = vpack.c.bf16 %v923_v43, %v923_v43  ;;  %v939_v48 = vsel %vm875_vm11, %v843_v30, %v907_v38  ;;  %v828_v50 = vadd.f32 %v1646_v49, %v789_v39  ;;  %v672_v52 = vpop.f32.mrb[11].mxu0  ;;  %v736_v53 = vpop.f32.mrb[11].mxu1  ;;  %v790_v55 = vmul.f32 %v1641_v47, %v670_v44 }
 0x116   : > { %v844_v51 = vadd.f32 %v1646_v49, %v805_v40  ;;  %v1366_v54 = vpack.c.bf16 %v939_v48, %v939_v48  ;;  %v806_v56 = vmul.f32 %v1641_v47, %v734_v45 }
 0x117   : > { %1084 = vst.msk [vmem:[%s1660_s29 + $0xc] sm:$0xf] %vm1080_vm5, %v1350_v46  ;;  %vm860_vm12 = vcmp.gt.f32.partialorder %v828_v50, 0.0  ;;  %v892_v57 = vmul.f32 0.1, %v828_v50  ;;  %v829_v59 = vadd.f32 %v1646_v49, %v790_v55 }
 0x118   : > { %vm876_vm13 = vcmp.gt.f32.partialorder %v844_v51, 0.0  ;;  %v908_v58 = vmul.f32 0.1, %v844_v51  ;;  %1100 = vst.msk [vmem:[%s1660_s29 + $0x4c] sm:$0xf] %vm1080_vm5, %v1366_v54  ;;  %v845_v60 = vadd.f32 %v1646_v49, %v806_v56 }
 0x119   : > { %v924_v61 = vsel %vm860_vm12, %v828_v50, %v892_v57  ;;  %vm861_vm14 = vcmp.gt.f32.partialorder %v829_v59, 0.0  ;;  %v893_v1 = vmul.f32 0.1, %v829_v59 }
 0x11a   : > { %v940_v62 = vsel %vm876_vm13, %v844_v51, %v908_v58  ;;  %v1351_v63 = vpack.c.bf16 %v924_v61, %v924_v61  ;;  %v675_v2 = vpop.f32.mrb[12].mxu0  ;;  %v739_v3 = vpop.f32.mrb[12].mxu1  ;;  %vm877_vm15 = vcmp.gt.f32.partialorder %v845_v60, 0.0  ;;  %v909_v4 = vmul.f32 0.1, %v845_v60 }
 0x11b   : > { %v1367_v0 = vpack.c.bf16 %v940_v62, %v940_v62  ;;  %v791_v5 = vmul.f32 %v1641_v47, %v675_v2  ;;  %v807_v6 = vmul.f32 %v1641_v47, %v739_v3  ;;  %v677_v7 = vpop.f32.mrb[13].mxu0  ;;  %v741_v8 = vpop.f32.mrb[13].mxu1  ;;  %v925_v9 = vsel %vm861_vm14, %v829_v59, %v893_v1 }
 0x11c   : > { %1085 = vst.msk [vmem:[%s1660_s29 + $0x10] sm:$0xf] %vm1080_vm5, %v1351_v63  ;;  %v678_v10 = vpop.f32.mrb[14].mxu0  ;;  %v742_v11 = vpop.f32.mrb[14].mxu1  ;;  %v1352_v12 = vpack.c.bf16 %v925_v9, %v925_v9  ;;  %v941_v13 = vsel %vm877_vm15, %v845_v60, %v909_v4 }
 0x11d   : > { %1101 = vst.msk [vmem:[%s1660_s29 + $0x50] sm:$0xf] %vm1080_vm5, %v1367_v0  ;;  %v830_v14 = vadd.f32 %v1646_v49, %v791_v5  ;;  %v846_v15 = vadd.f32 %v1646_v49, %v807_v6  ;;  %v680_v16 = vpop.f32.mrb[15].mxu0  ;;  %v744_v17 = vpop.f32.mrb[15].mxu1  ;;  %v1368_v18 = vpack.c.bf16 %v941_v13, %v941_v13  ;;  %v792_v19 = vmul.f32 %v1641_v47, %v678_v10 }
 0x11e   : > { %v808_v20 = vmul.f32 %v1641_v47, %v742_v11  ;;  %1086 = vst.msk [vmem:[%s1660_s29 + $0x14] sm:$0xf] %vm1080_vm5, %v1352_v12 }
 0x11f   : > { %vm862_vm0 = vcmp.gt.f32.partialorder %v830_v14, 0.0  ;;  %v894_v21 = vmul.f32 0.1, %v830_v14  ;;  %vm878_vm1 = vcmp.gt.f32.partialorder %v846_v15, 0.0  ;;  %v910_v22 = vmul.f32 0.1, %v846_v15 }
 0x120   : > { %1102 = vst.msk [vmem:[%s1660_s29 + $0x54] sm:$0xf] %vm1080_vm5, %v1368_v18  ;;  %v831_v23 = vadd.f32 %v1646_v49, %v792_v19  ;;  %v847_v24 = vadd.f32 %v1646_v49, %v808_v20 }
 0x121   : > { %v926_v25 = vsel %vm862_vm0, %v830_v14, %v894_v21  ;;  %v942_v26 = vsel %vm878_vm1, %v846_v15, %v910_v22 }
 0x122   : > { %v1353_v27 = vpack.c.bf16 %v926_v25, %v926_v25  ;;  %v1369_v28 = vpack.c.bf16 %v942_v26, %v942_v26  ;;  %vm863_vm2 = vcmp.gt.f32.partialorder %v831_v23, 0.0  ;;  %v895_v29 = vmul.f32 0.1, %v831_v23  ;;  %v683_v30 = vpop.f32.mrb[16].mxu0  ;;  %v747_v31 = vpop.f32.mrb[16].mxu1 }
 0x123   : > { %vm879_vm3 = vcmp.gt.f32.partialorder %v847_v24, 0.0  ;;  %v911_v32 = vmul.f32 0.1, %v847_v24  ;;  %v793_v33 = vmul.f32 %v1641_v47, %v683_v30  ;;  %v809_v34 = vmul.f32 %v1641_v47, %v747_v31  ;;  %v685_v35 = vpop.f32.mrb[17].mxu0  ;;  %v749_v36 = vpop.f32.mrb[17].mxu1 }
 0x124   : > { %1087 = vst.msk [vmem:[%s1660_s29 + $0x18] sm:$0xf] %vm1080_vm5, %v1353_v27  ;;  %1103 = vst.msk [vmem:[%s1660_s29 + $0x58] sm:$0xf] %vm1080_vm5, %v1369_v28  ;;  %v927_v37 = vsel %vm863_vm2, %v831_v23, %v895_v29  ;;  %v686_v38 = vpop.f32.mrb[18].mxu0  ;;  %v750_v39 = vpop.f32.mrb[18].mxu1 }
 0x125   : > { %v1354_v40 = vpack.c.bf16 %v927_v37, %v927_v37  ;;  %v943_v41 = vsel %vm879_vm3, %v847_v24, %v911_v32  ;;  %v832_v42 = vadd.f32 %v1646_v49, %v793_v33  ;;  %v848_v43 = vadd.f32 %v1646_v49, %v809_v34  ;;  %v688_v44 = vpop.f32.mrb[19].mxu0  ;;  %v752_v45 = vpop.f32.mrb[19].mxu1 }
 0x126   : > { %v1370_v46 = vpack.c.bf16 %v943_v41, %v943_v41  ;;  %v794_v48 = vmul.f32 %v1641_v47, %v686_v38  ;;  %v810_v50 = vmul.f32 %v1641_v47, %v750_v39 }
 0x127   : > { %1088 = vst.msk [vmem:[%s1660_s29 + $0x1c] sm:$0xf] %vm1080_vm5, %v1354_v40  ;;  %vm864_vm4 = vcmp.gt.f32.partialorder %v832_v42, 0.0  ;;  %v896_v51 = vmul.f32 0.1, %v832_v42  ;;  %vm880_vm6 = vcmp.gt.f32.partialorder %v848_v43, 0.0 }
 0x128   : > { %v912_v52 = vmul.f32 0.1, %v848_v43  ;;  %1104 = vst.msk [vmem:[%s1660_s29 + $0x5c] sm:$0xf] %vm1080_vm5, %v1370_v46  ;;  %v833_v53 = vadd.f32 %v1646_v49, %v794_v48  ;;  %v849_v54 = vadd.f32 %v1646_v49, %v810_v50 }
 0x129   : > { %v928_v55 = vsel %vm864_vm4, %v832_v42, %v896_v51 }
 0x12a   : > { %v944_v56 = vsel %vm880_vm6, %v848_v43, %v912_v52  ;;  %v1355_v57 = vpack.c.bf16 %v928_v55, %v928_v55  ;;  %vm865_vm7 = vcmp.gt.f32.partialorder %v833_v53, 0.0  ;;  %v897_v59 = vmul.f32 0.1, %v833_v53  ;;  %v691_v60 = vpop.f32.mrb[20].mxu0  ;;  %v755_v61 = vpop.f32.mrb[20].mxu1 }
 0x12b   : > { %v1371_v58 = vpack.c.bf16 %v944_v56, %v944_v56  ;;  %vm881_vm8 = vcmp.gt.f32.partialorder %v849_v54, 0.0  ;;  %v913_v62 = vmul.f32 0.1, %v849_v54  ;;  %v795_v63 = vmul.f32 %v1641_v47, %v691_v60  ;;  %v693_v1 = vpop.f32.mrb[21].mxu0  ;;  %v757_v2 = vpop.f32.mrb[21].mxu1 }
 0x12c   : > { %v811_v0 = vmul.f32 %v1641_v47, %v755_v61  ;;  %1089 = vst.msk [vmem:[%s1660_s29 + $0x20] sm:$0xf] %vm1080_vm5, %v1355_v57  ;;  %v929_v3 = vsel %vm865_vm7, %v833_v53, %v897_v59  ;;  %v694_v4 = vpop.f32.mrb[22].mxu0  ;;  %v758_v5 = vpop.f32.mrb[22].mxu1 }
 0x12d   : > { %1105 = vst.msk [vmem:[%s1660_s29 + $0x60] sm:$0xf] %vm1080_vm5, %v1371_v58  ;;  %v1356_v6 = vpack.c.bf16 %v929_v3, %v929_v3  ;;  %v945_v7 = vsel %vm881_vm8, %v849_v54, %v913_v62  ;;  %v834_v8 = vadd.f32 %v1646_v49, %v795_v63  ;;  %v696_v10 = vpop.f32.mrb[23].mxu0  ;;  %v760_v11 = vpop.f32.mrb[23].mxu1  ;;  %v796_v13 = vmul.f32 %v1641_v47, %v694_v4 }
 0x12e   : > { %v850_v9 = vadd.f32 %v1646_v49, %v811_v0  ;;  %v1372_v12 = vpack.c.bf16 %v945_v7, %v945_v7  ;;  %v812_v14 = vmul.f32 %v1641_v47, %v758_v5 }
 0x12f   : > { %1090 = vst.msk [vmem:[%s1660_s29 + $0x24] sm:$0xf] %vm1080_vm5, %v1356_v6  ;;  %vm866_vm9 = vcmp.gt.f32.partialorder %v834_v8, 0.0  ;;  %v898_v15 = vmul.f32 0.1, %v834_v8  ;;  %v835_v17 = vadd.f32 %v1646_v49, %v796_v13 }
 0x130   : > { %vm882_vm10 = vcmp.gt.f32.partialorder %v850_v9, 0.0  ;;  %v914_v16 = vmul.f32 0.1, %v850_v9  ;;  %1106 = vst.msk [vmem:[%s1660_s29 + $0x64] sm:$0xf] %vm1080_vm5, %v1372_v12  ;;  %v851_v18 = vadd.f32 %v1646_v49, %v812_v14 }
 0x131   : > { %v930_v19 = vsel %vm866_vm9, %v834_v8, %v898_v15  ;;  %vm867_vm11 = vcmp.gt.f32.partialorder %v835_v17, 0.0  ;;  %v899_v23 = vmul.f32 0.1, %v835_v17 }
 0x132   : > { %v946_v20 = vsel %vm882_vm10, %v850_v9, %v914_v16  ;;  %v1357_v21 = vpack.c.bf16 %v930_v19, %v930_v19  ;;  %v699_v24 = vpop.f32.mrb[24].mxu0  ;;  %v763_v25 = vpop.f32.mrb[24].mxu1  ;;  %vm883_vm12 = vcmp.gt.f32.partialorder %v851_v18, 0.0  ;;  %v915_v26 = vmul.f32 0.1, %v851_v18 }
 0x133   : > { %v1373_v22 = vpack.c.bf16 %v946_v20, %v946_v20  ;;  %v797_v27 = vmul.f32 %v1641_v47, %v699_v24  ;;  %v813_v28 = vmul.f32 %v1641_v47, %v763_v25  ;;  %v701_v29 = vpop.f32.mrb[25].mxu0  ;;  %v765_v30 = vpop.f32.mrb[25].mxu1  ;;  %v931_v31 = vsel %vm867_vm11, %v835_v17, %v899_v23 }
 0x134   : > { %1091 = vst.msk [vmem:[%s1660_s29 + $0x28] sm:$0xf] %vm1080_vm5, %v1357_v21  ;;  %v702_v32 = vpop.f32.mrb[26].mxu0  ;;  %v766_v33 = vpop.f32.mrb[26].mxu1  ;;  %v1358_v34 = vpack.c.bf16 %v931_v31, %v931_v31  ;;  %v947_v35 = vsel %vm883_vm12, %v851_v18, %v915_v26 }
 0x135   : > { %1107 = vst.msk [vmem:[%s1660_s29 + $0x68] sm:$0xf] %vm1080_vm5, %v1373_v22  ;;  %v836_v36 = vadd.f32 %v1646_v49, %v797_v27  ;;  %v852_v37 = vadd.f32 %v1646_v49, %v813_v28  ;;  %v704_v38 = vpop.f32.mrb[27].mxu0  ;;  %v768_v39 = vpop.f32.mrb[27].mxu1  ;;  %v1374_v40 = vpack.c.bf16 %v947_v35, %v947_v35  ;;  %v798_v41 = vmul.f32 %v1641_v47, %v702_v32 }
 0x136   : > { %v814_v42 = vmul.f32 %v1641_v47, %v766_v33  ;;  %1092 = vst.msk [vmem:[%s1660_s29 + $0x2c] sm:$0xf] %vm1080_vm5, %v1358_v34 }
 0x137   : > { %vm868_vm13 = vcmp.gt.f32.partialorder %v836_v36, 0.0  ;;  %v900_v43 = vmul.f32 0.1, %v836_v36  ;;  %vm884_vm14 = vcmp.gt.f32.partialorder %v852_v37, 0.0  ;;  %v916_v44 = vmul.f32 0.1, %v852_v37 }
 0x138   : > { %1108 = vst.msk [vmem:[%s1660_s29 + $0x6c] sm:$0xf] %vm1080_vm5, %v1374_v40  ;;  %v837_v45 = vadd.f32 %v1646_v49, %v798_v41  ;;  %v853_v46 = vadd.f32 %v1646_v49, %v814_v42 }
 0x139   : > { %v932_v48 = vsel %vm868_vm13, %v836_v36, %v900_v43  ;;  %v948_v50 = vsel %vm884_vm14, %v852_v37, %v916_v44 }
 0x13a   : > { %v1359_v51 = vpack.c.bf16 %v932_v48, %v932_v48  ;;  %v1375_v52 = vpack.c.bf16 %v948_v50, %v948_v50  ;;  %vm869_vm15 = vcmp.gt.f32.partialorder %v837_v45, 0.0  ;;  %v901_v53 = vmul.f32 0.1, %v837_v45  ;;  %v707_v54 = vpop.f32.mrb[28].mxu0  ;;  %v771_v55 = vpop.f32.mrb[28].mxu1 }
 0x13b   : > { %vm885_vm0 = vcmp.gt.f32.partialorder %v853_v46, 0.0  ;;  %v917_v56 = vmul.f32 0.1, %v853_v46  ;;  %v799_v57 = vmul.f32 %v1641_v47, %v707_v54  ;;  %v815_v58 = vmul.f32 %v1641_v47, %v771_v55  ;;  %v709_v59 = vpop.f32.mrb[29].mxu0  ;;  %v773_v60 = vpop.f32.mrb[29].mxu1 }
 0x13c   : > { %1093 = vst.msk [vmem:[%s1660_s29 + $0x30] sm:$0xf] %vm1080_vm5, %v1359_v51  ;;  %1109 = vst.msk [vmem:[%s1660_s29 + $0x70] sm:$0xf] %vm1080_vm5, %v1375_v52  ;;  %v933_v61 = vsel %vm869_vm15, %v837_v45, %v901_v53  ;;  %v710_v62 = vpop.f32.mrb[30].mxu0  ;;  %v774_v63 = vpop.f32.mrb[30].mxu1 }
 0x13d   : > { %v1360_v0 = vpack.c.bf16 %v933_v61, %v933_v61  ;;  %v949_v1 = vsel %vm885_vm0, %v853_v46, %v917_v56  ;;  %v838_v2 = vadd.f32 %v1646_v49, %v799_v57  ;;  %v854_v3 = vadd.f32 %v1646_v49, %v815_v58  ;;  %v712_v4 = vpop.f32.mrb[31].mxu0  ;;  %v776_v5 = vpop.f32.mrb[31].mxu1 }
 0x13e   : > { %v1376_v6 = vpack.c.bf16 %v949_v1, %v949_v1  ;;  %v800_v7 = vmul.f32 %v1641_v47, %v710_v62  ;;  %v816_v8 = vmul.f32 %v1641_v47, %v774_v63 }
 0x13f   : > { %1094 = vst.msk [vmem:[%s1660_s29 + $0x34] sm:$0xf] %vm1080_vm5, %v1360_v0  ;;  %vm870_vm1 = vcmp.gt.f32.partialorder %v838_v2, 0.0  ;;  %v902_v9 = vmul.f32 0.1, %v838_v2  ;;  %vm886_vm2 = vcmp.gt.f32.partialorder %v854_v3, 0.0 }
 0x140   : > { %v918_v10 = vmul.f32 0.1, %v854_v3  ;;  %1110 = vst.msk [vmem:[%s1660_s29 + $0x74] sm:$0xf] %vm1080_vm5, %v1376_v6  ;;  %v839_v11 = vadd.f32 %v1646_v49, %v800_v7  ;;  %v855_v12 = vadd.f32 %v1646_v49, %v816_v8 }
 0x141   : > { %v934_v13 = vsel %vm870_vm1, %v838_v2, %v902_v9 }
 0x142   : > { %v950_v14 = vsel %vm886_vm2, %v854_v3, %v918_v10  ;;  %v1361_v15 = vpack.c.bf16 %v934_v13, %v934_v13  ;;  %vm871_vm3 = vcmp.gt.f32.partialorder %v839_v11, 0.0  ;;  %v903_v16 = vmul.f32 0.1, %v839_v11 }
 0x143   : > { %v1377_v47 = vpack.c.bf16 %v950_v14, %v950_v14  ;;  %vm887_vm4 = vcmp.gt.f32.partialorder %v855_v12, 0.0  ;;  %v919_v17 = vmul.f32 0.1, %v855_v12 }
 0x144   : > { %1095 = vst.msk [vmem:[%s1660_s29 + $0x38] sm:$0xf] %vm1080_vm5, %v1361_v15  ;;  %v935_v18 = vsel %vm871_vm3, %v839_v11, %v903_v16 }
 0x145   : > { %1111 = vst.msk [vmem:[%s1660_s29 + $0x78] sm:$0xf] %vm1080_vm5, %v1377_v47  ;;  %v1362_v19 = vpack.c.bf16 %v935_v18, %v935_v18  ;;  %v951_v20 = vsel %vm887_vm4, %v855_v12, %v919_v17 }
 0x146   : > { %v1378_v21 = vpack.c.bf16 %v951_v20, %v951_v20 }
 0x147   : > { %1096 = vst.msk [vmem:[%s1660_s29 + $0x3c] sm:$0xf] %vm1080_vm5, %v1362_v19 }
 0x148   : > { %1112 = vst.msk [vmem:[%s1660_s29 + $0x7c] sm:$0xf] %vm1080_vm5, %v1378_v21 }
 0x149 PF: > { %s14_s17 = sadd.s32 1, %s1505_s17   ;;  %s1796_s15 = smov %s1501_s16 }
 0x14a   : > { %p11_p5 = scmp.ge.s32.totalorder %s14_s17, 10   ;;  %s1797_s16 = smov %s1799_s18 }
 0x14c   :  { %13 = sbr.rel (!%p11_p5) target bundleno = 2 (0x2), region = 75 }

</bundles_post_ra>
